<compile_context>
chip_gen: v7x
topology: tpu7x:2x2x1
jax: 0.10.0
libtpu: 0.0.40
codegen_flags: <defaults>
</compile_context>

<pallas_src>
import jax
import jax.numpy as jnp
from jax.experimental import pallas as pl
from jax.experimental.pallas import tpu as pltpu


def _linear_softmax_kernel(x_ref, w_ref, b_ref, o_ref):
    # x_ref: (B, D) native dtype, w_ref: (D, N) bf16, b_ref: (1, N) f32,
    # o_ref: (B, N) f32.
    x = x_ref[...].astype(w_ref.dtype)          # feed the MXU in the weight dtype (bf16)
    logits = jnp.dot(x, w_ref[...],
                     preferred_element_type=jnp.float32) + b_ref[...]
    # Numerically stable softmax over dim=1.
    m = jnp.max(logits, axis=1, keepdims=True)
    e = jnp.exp(logits - m)
    denom = jnp.sum(e, axis=1, keepdims=True)
    o_ref[...] = (e * pl.reciprocal(denom, approx=True)).astype(o_ref.dtype)


def linear_net_forward(x, w_t, b):
    """x: [B, C, H, W] (or already [B, D]) in its native dtype;
    w_t: [D, N] (bfloat16 recommended); b: [N]."""
    B = x.shape[0]
    x2d = x.reshape(B, -1)                       # flatten like x.view(B, -1); no cast here
    D, N = w_t.shape
    b2d = b.reshape(1, N).astype(jnp.float32)

    # Single invocation, no grid: whole problem lives in VMEM, no pipeline machinery.
    return pl.pallas_call(
        _linear_softmax_kernel,
        out_shape=jax.ShapeDtypeStruct((B, N), jnp.float32),
        in_specs=[
            pl.BlockSpec(memory_space=pltpu.MemorySpace.VMEM),  # x2d
            pl.BlockSpec(memory_space=pltpu.MemorySpace.VMEM),  # w_t
            pl.BlockSpec(memory_space=pltpu.MemorySpace.VMEM),  # bias
        ],
        out_specs=pl.BlockSpec(memory_space=pltpu.MemorySpace.VMEM),
    )(x2d, w_t, b2d)


if __name__ == "__main__":
    # Small shapes consistent with the module: x = [2, 4, 16, 16] -> D = 1024, N = 32
    B, C, H, W = 2, 4, 16, 16
    D = C * H * W
    N = 32

    key = jax.random.PRNGKey(0)
    kx, kw, kb = jax.random.split(key, 3)

    x = jax.random.normal(kx, (B, C, H, W), dtype=jnp.float32)

    # Deterministic parameter init matching nn.Linear's U(-1/sqrt(fan_in), 1/sqrt(fan_in))
    bound = 1.0 / (D ** 0.5)
    weight = jax.random.uniform(kw, (N, D), minval=-bound, maxval=bound,
                                dtype=jnp.float32)   # PyTorch layout [out, in]
    bias = jax.random.uniform(kb, (N,), minval=-bound, maxval=bound,
                              dtype=jnp.float32)

    # Weight stored pre-transposed [D, N] and in bf16 (halves the dominant HBM read).
    w_t_bf16 = weight.T.astype(jnp.bfloat16)

    y = linear_net_forward(x, w_t_bf16, bias)
    jax.block_until_ready(y)

    # Sanity check against pure-JAX f32 reference (tolerance relaxed for bf16
    # weights/activations on the MXU and the approx reciprocal).
    ref = jax.nn.softmax(x.reshape(B, -1) @ weight.T + bias, axis=1)
    assert y.shape == (B, N)
    assert jnp.allclose(y, ref, atol=3e-3, rtol=3e-2)
    assert jnp.allclose(jnp.sum(y, axis=1), jnp.ones((B,)), atol=1e-2)

    print("KERNEL_OK")
</pallas_src>

<mosaic_0001>
module attributes {stable_mosaic.version = 11 : i64} {
  func.func @_linear_softmax_kernel(%arg0: memref<2x1024xf32, #tpu.memory_space<vmem>>, %arg1: memref<1024x32xbf16, #tpu.memory_space<vmem>>, %arg2: memref<1x32xf32, #tpu.memory_space<vmem>>, %arg3: memref<2x32xf32, #tpu.memory_space<vmem>>) attributes {dimension_semantics = [], scalar_prefetch = 0 : i64, scratch_operands = 0 : i64, tpu.core_type = #tpu.core_type<tc>} {
    %c0 = arith.constant 0 : index
    %c0_0 = arith.constant 0 : index
    %0 = vector.load %arg0[%c0, %c0_0] : memref<2x1024xf32, #tpu.memory_space<vmem>>, vector<2x1024xf32>
    %1 = arith.truncf %0 : vector<2x1024xf32> to vector<2x1024xbf16>
    %c0_1 = arith.constant 0 : index
    %c0_2 = arith.constant 0 : index
    %2 = vector.load %arg1[%c0_1, %c0_2] : memref<1024x32xbf16, #tpu.memory_space<vmem>>, vector<1024x32xbf16>
    %cst = arith.constant dense<0.000000e+00> : vector<2x32xf32>
    %3 = tpu.matmul %1, %2, %cst {dimension_numbers = #tpu.dot_dimension_numbers<[1], [0], [0], [1], [0, 0, 1, 1], [], []>} : vector<2x1024xbf16>, vector<1024x32xbf16>, vector<2x32xf32> -> vector<2x32xf32>
    %c0_3 = arith.constant 0 : index
    %c0_4 = arith.constant 0 : index
    %4 = vector.load %arg2[%c0_3, %c0_4] : memref<1x32xf32, #tpu.memory_space<vmem>>, vector<1x32xf32>
    %5 = vector.broadcast %4 : vector<1x32xf32> to vector<2x32xf32>
    %6 = arith.addf %3, %5 : vector<2x32xf32>
    %cst_5 = arith.constant dense<0xFF800000> : vector<2xf32>
    %7 = vector.multi_reduction <maximumf>, %6, %cst_5 [1] : vector<2x32xf32> to vector<2xf32>
    %8 = vector.shape_cast %7 : vector<2xf32> to vector<2x1xf32>
    %9 = vector.broadcast %8 : vector<2x1xf32> to vector<2x32xf32>
    %10 = arith.subf %6, %9 : vector<2x32xf32>
    %11 = math.exp %10 : vector<2x32xf32>
    %cst_6 = arith.constant dense<0.000000e+00> : vector<2xf32>
    %12 = vector.multi_reduction <add>, %11, %cst_6 [1] : vector<2x32xf32> to vector<2xf32>
    %13 = vector.shape_cast %12 : vector<2xf32> to vector<2x1xf32>
    %14 = tpu.reciprocal %13 {approx = true} : vector<2x1xf32> -> vector<2x1xf32>
    %15 = vector.broadcast %14 : vector<2x1xf32> to vector<2x32xf32>
    %16 = arith.mulf %11, %15 : vector<2x32xf32>
    %c0_7 = arith.constant 0 : index
    %c0_8 = arith.constant 0 : index
    %17 = vector.load %arg3[%c0_7, %c0_8] : memref<2x32xf32, #tpu.memory_space<vmem>>, vector<2x32xf32>
    tpu.vector_store %arg3[%c0_7, %c0_8], %16 {strides = array<i32>} : memref<2x32xf32, #tpu.memory_space<vmem>>, vector<2x32xf32>,
    return
  }
}

</mosaic_0001>

<bundles_post_ra>
// kernel: tpu_custom_call.1
= control target key start
LH: loop header
LB: loop body
LE: loop exit
PB: predicated region body
PF: predicated region fallthrough
CT: control target
= control target key end

     0   :  { %v24_v28 = vlaneseq  ;;  %v1025_v36 = vmov 1983009808   ;;  %s1269_s0 = inlined_call_operand.vmem [shape: f32[2,1024], index: 0, kind: input, shape index: {}]   ;;  %s1270_s1 = inlined_call_operand.vmem [shape: bf16[1024,32], index: 1, kind: input, shape index: {}]   ;;  %s1271_s2 = inlined_call_operand.vmem [shape: f32[1,32], index: 2, kind: input, shape index: {}]   ;;  %s1272_s3 = inlined_call_operand.hbm [shape: f32[2,32], index: 3, kind: output, shape index: {}]  }
   0x1   :  { %v931_v0 = vld [vmem:[%s1270_s1 + $0x40] sm:$0xff]   ;;  %v935_v4 = vld [vmem:[%s1270_s1 + $0x48] sm:$0xff]   ;;  %v939_v8 = vld [vmem:[%s1270_s1 + $0x50] sm:$0xff]   ;;  %v22_v37 = vunpack.c.l.s4 %v1025_v36 }
   0x2   :  { %v932_v1 = vld [vmem:[%s1270_s1 + $0xc0] sm:$0xff]   ;;  %841 = vmatprep.subr.bf16.mxu0 %v931_v0  ;;  %v936_v5 = vld [vmem:[%s1270_s1 + $0xc8] sm:$0xff]   ;;  %v940_v9 = vld [vmem:[%s1270_s1 + $0xd0] sm:$0xff]   ;;  %v25_v33 = vshrl.u32 %v24_v28, 7 }
   0x3   :  { %v933_v2 = vld [vmem:[%s1270_s1] sm:$0xff]   ;;  %863 = vmatprep.subr.bf16.mxu1 %v932_v1  ;;  %v937_v6 = vld [vmem:[%s1270_s1 + $0x8] sm:$0xff]   ;;  %v941_v10 = vld [vmem:[%s1270_s1 + $0x10] sm:$0xff]   ;;  %v23_v39 = vunpack.c.0.s8 %v22_v37 }
   0x4   :  { %v934_v3 = vld [vmem:[%s1270_s1 + $0x80] sm:$0xff]   ;;  %842 = vmatpush3.bf16.msra.mxu0 %v933_v2  ;;  %v938_v7 = vld [vmem:[%s1270_s1 + $0x88] sm:$0xff]   ;;  %v942_v11 = vld [vmem:[%s1270_s1 + $0x90] sm:$0xff]  }
   0x5   :  { %864 = vmatpush3.bf16.msra.mxu1 %v934_v3  ;;  %843 = vmatprep.subr.bf16.mxu0 %v935_v4  ;;  %v943_v12 = vld [vmem:[%s1270_s1 + $0x58] sm:$0xff]   ;;  %v947_v16 = vld [vmem:[%s1270_s1 + $0x60] sm:$0xff]   ;;  %v951_v20 = vld [vmem:[%s1270_s1 + $0x68] sm:$0xff]   ;;  %v1152_v41 = vsub.s32 %v23_v39, %v25_v33 }
   0x6   :  { %865 = vmatprep.subr.bf16.mxu1 %v936_v5  ;;  %v944_v13 = vld [vmem:[%s1270_s1 + $0xd8] sm:$0xff]   ;;  %v948_v17 = vld [vmem:[%s1270_s1 + $0xe0] sm:$0xff]   ;;  %v952_v21 = vld [vmem:[%s1270_s1 + $0xe8] sm:$0xff]  }
   0x7   :  { %v945_v14 = vld [vmem:[%s1270_s1 + $0x18] sm:$0xff]   ;;  %v949_v18 = vld [vmem:[%s1270_s1 + $0x20] sm:$0xff]   ;;  %v953_v22 = vld [vmem:[%s1270_s1 + $0x28] sm:$0xff]  }
   0x8   :  { %844 = vmatpush3.bf16.msra.mxu0 %v937_v6  ;;  %v946_v15 = vld [vmem:[%s1270_s1 + $0x98] sm:$0xff]   ;;  %v950_v19 = vld [vmem:[%s1270_s1 + $0xa0] sm:$0xff]   ;;  %v954_v23 = vld [vmem:[%s1270_s1 + $0xa8] sm:$0xff]  }
   0x9   :  { %866 = vmatpush3.bf16.msra.mxu1 %v938_v7  ;;  %845 = vmatprep.subr.bf16.mxu0 %v939_v8  ;;  %v955_v24 = vld [vmem:[%s1270_s1 + $0x70] sm:$0xff]   ;;  %v959_v29 = vld [vmem:[%s1270_s1 + $0x78] sm:$0xff]   ;;  %v16_v34 = vld [vmem:[%s1269_s0] sm:$0xff] }
   0xa   :  { %867 = vmatprep.subr.bf16.mxu1 %v940_v9  ;;  %v956_v25 = vld [vmem:[%s1270_s1 + $0xf0] sm:$0xff]   ;;  %v960_v30 = vld [vmem:[%s1270_s1 + $0xf8] sm:$0xff]   ;;  %v964_v35 = vld [vmem:[%s1270_s1 + $0x140] sm:$0xff]   ;;  %v20_v40 = vcombine.high %v16_v34, %v16_v34  ;;  %v27_v42 = vrot.slane %v16_v34, %v1152_v41 }
   0xb   :  { %v957_v26 = vld [vmem:[%s1270_s1 + $0x30] sm:$0xff]   ;;  %v961_v31 = vld [vmem:[%s1270_s1 + $0x38] sm:$0xff]   ;;  %v965_v38 = vld [vmem:[%s1270_s1 + $0x1c0] sm:$0xff]  }
   0xc   :  { %846 = vmatpush3.bf16.msra.mxu0 %v941_v10  ;;  %v958_v27 = vld [vmem:[%s1270_s1 + $0xb0] sm:$0xff]   ;;  %v962_v32 = vld [vmem:[%s1270_s1 + $0xb8] sm:$0xff]   ;;  %v34_v43 = vrot.slane %v20_v40, %v1152_v41  ;;  %v35_v44 = vcombine.high %v27_v42, %v27_v42  ;;  %v966_v46 = vld [vmem:[%s1270_s1 + $0x100] sm:$0xff]   ;;  %v62_v47 = vpack.c.bf16 %v27_v42, %v27_v42 }
   0xd   :  { %868 = vmatpush3.bf16.msra.mxu1 %v942_v11  ;;  %847 = vmatprep.subr.bf16.mxu0 %v943_v12  ;;  %v967_v49 = vld [vmem:[%s1270_s1 + $0x180] sm:$0xff]   ;;  %v968_v52 = vld [vmem:[%s1270_s1 + $0x148] sm:$0xff]   ;;  %v972_v56 = vld [vmem:[%s1270_s1 + $0x150] sm:$0xff]  }
   0xe   :  { %869 = vmatprep.subr.bf16.mxu1 %v944_v13  ;;  %v36_v45 = vcombine.high %v34_v43, %v34_v43  ;;  %v64_v48 = vpack.c.bf16 %v34_v43, %v34_v43  ;;  %v63_v50 = vpack.c.bf16 %v35_v44, %v35_v44  ;;  %v969_v53 = vld [vmem:[%s1270_s1 + $0x1c8] sm:$0xff]   ;;  %v973_v57 = vld [vmem:[%s1270_s1 + $0x1d0] sm:$0xff]   ;;  %v976_v60 = vld [vmem:[%s1270_s1 + $0x158] sm:$0xff]  }
   0xf   :  { %v970_v54 = vld [vmem:[%s1270_s1 + $0x108] sm:$0xff]   ;;  %v974_v58 = vld [vmem:[%s1270_s1 + $0x110] sm:$0xff]   ;;  %v977_v61 = vld [vmem:[%s1270_s1 + $0x1d8] sm:$0xff]  }
  0x10   :  { %848 = vmatpush3.bf16.msra.mxu0 %v945_v14  ;;  %v65_v51 = vpack.c.bf16 %v36_v45, %v36_v45  ;;  %621 = vmatprep.mubr.bf16.mxu0 %v63_v50  ;;  %v971_v55 = vld [vmem:[%s1270_s1 + $0x188] sm:$0xff]   ;;  %v975_v59 = vld [vmem:[%s1270_s1 + $0x190] sm:$0xff]   ;;  %v978_v62 = vld [vmem:[%s1270_s1 + $0x118] sm:$0xff]  }
  0x11   :  { %870 = vmatpush3.bf16.msra.mxu1 %v946_v15  ;;  %849 = vmatprep.subr.bf16.mxu0 %v947_v16  ;;  %v979_v63 = vld [vmem:[%s1270_s1 + $0x198] sm:$0xff]   ;;  %v980_v0 = vld [vmem:[%s1270_s1 + $0x160] sm:$0xff]   ;;  %v984_v4 = vld [vmem:[%s1270_s1 + $0x168] sm:$0xff]  }
  0x12   :  { %871 = vmatprep.subr.bf16.mxu1 %v948_v17  ;;  %661 = vmatprep.mubr.bf16.mxu1 %v65_v51  ;;  %v981_v1 = vld [vmem:[%s1270_s1 + $0x1e0] sm:$0xff]   ;;  %v985_v5 = vld [vmem:[%s1270_s1 + $0x1e8] sm:$0xff]   ;;  %v988_v8 = vld [vmem:[%s1270_s1 + $0x170] sm:$0xff]  }
  0x13   :  { %v982_v2 = vld [vmem:[%s1270_s1 + $0x120] sm:$0xff]   ;;  %v986_v6 = vld [vmem:[%s1270_s1 + $0x128] sm:$0xff]   ;;  %v989_v9 = vld [vmem:[%s1270_s1 + $0x1f0] sm:$0xff]  }
  0x14   :  { %850 = vmatpush3.bf16.msra.mxu0 %v949_v18  ;;  %v983_v3 = vld [vmem:[%s1270_s1 + $0x1a0] sm:$0xff]   ;;  %v987_v7 = vld [vmem:[%s1270_s1 + $0x1a8] sm:$0xff]  }
  0x15   :  { %872 = vmatpush3.bf16.msra.mxu1 %v950_v19  ;;  %851 = vmatprep.subr.bf16.mxu0 %v951_v20  ;;  %v17_v10 = vld [vmem:[%s1269_s0 + $0x8] sm:$0xff] }
  0x16   :  { %873 = vmatprep.subr.bf16.mxu1 %v952_v21 }
  0x18   :  { %852 = vmatpush3.bf16.msra.mxu0 %v953_v22 }
  0x19   :  { %874 = vmatpush3.bf16.msra.mxu1 %v954_v23  ;;  %853 = vmatprep.subr.bf16.mxu0 %v955_v24 }
  0x1a   :  { %875 = vmatprep.subr.bf16.mxu1 %v956_v25 }
  0x1c   :  { %854 = vmatpush3.bf16.msra.mxu0 %v957_v26 }
  0x1d   :  { %876 = vmatpush3.bf16.msra.mxu1 %v958_v27  ;;  %855 = vmatprep.subr.bf16.mxu0 %v959_v29 }
  0x1e   :  { %877 = vmatprep.subr.bf16.mxu1 %v960_v30 }
  0x20   :  { %856 = vmatpush3.bf16.msra.mxu0 %v961_v31 }
  0x21   :  { %878 = vmatpush3.bf16.msra.mxu1 %v962_v32  ;;  %885 = vmatprep.subr.bf16.mxu0 %v964_v35 }
  0x22   :  { %907 = vmatprep.subr.bf16.mxu1 %v965_v38 }
  0x23   :  { %622 = vmatmul.mubr.bf16.vlgmr.msra.gmra.mrb[0].mxu0 %v62_v47 }
  0x24   :  { %662 = vmatmul.mubr.bf16.vlgmr.msra.gmra.mrb[0].mxu1 %v64_v48  ;;  %886 = vmatpush3.bf16.msra.mxu0 %v966_v46 }
  0x25   :  { %908 = vmatpush3.bf16.msra.mxu1 %v967_v49  ;;  %887 = vmatprep.subr.bf16.mxu0 %v968_v52 }
  0x26   :  { %909 = vmatprep.subr.bf16.mxu1 %v969_v53 }
  0x28   :  { %888 = vmatpush3.bf16.msra.mxu0 %v970_v54 }
  0x29   :  { %910 = vmatpush3.bf16.msra.mxu1 %v971_v55  ;;  %889 = vmatprep.subr.bf16.mxu0 %v972_v56 }
  0x2a   :  { %911 = vmatprep.subr.bf16.mxu1 %v973_v57 }
  0x2c   :  { %890 = vmatpush3.bf16.msra.mxu0 %v974_v58 }
  0x2d   :  { %912 = vmatpush3.bf16.msra.mxu1 %v975_v59  ;;  %891 = vmatprep.subr.bf16.mxu0 %v976_v60 }
  0x2e   :  { %913 = vmatprep.subr.bf16.mxu1 %v977_v61 }
  0x30   :  { %892 = vmatpush3.bf16.msra.mxu0 %v978_v62 }
  0x31   :  { %914 = vmatpush3.bf16.msra.mxu1 %v979_v63  ;;  %893 = vmatprep.subr.bf16.mxu0 %v980_v0 }
  0x32   :  { %915 = vmatprep.subr.bf16.mxu1 %v981_v1 }
  0x34   :  { %894 = vmatpush3.bf16.msra.mxu0 %v982_v2 }
  0x35   :  { %916 = vmatpush3.bf16.msra.mxu1 %v983_v3  ;;  %895 = vmatprep.subr.bf16.mxu0 %v984_v4 }
  0x36   :  { %917 = vmatprep.subr.bf16.mxu1 %v985_v5 }
  0x37   :  { %8 = vsyncpa [#allocation3], 0  ;;  %v44_v11 = vrot.slane %v17_v10, %v1152_v41  ;;  %v37_v12 = vcombine.high %v17_v10, %v17_v10  ;;  %v990_v13 = vld [vmem:[%s1270_s1 + $0x130] sm:$0xff]   ;;  %v992_v17 = vld [vmem:[%s1270_s1 + $0x178] sm:$0xff]   ;;  %vm749_vm0 = vcmask 254976  }
  0x38   :  { %896 = vmatpush3.bf16.msra.mxu0 %v986_v6  ;;  %v991_v14 = vld [vmem:[%s1270_s1 + $0x1b0] sm:$0xff]   ;;  %v993_v18 = vld [vmem:[%s1270_s1 + $0x1f8] sm:$0xff]   ;;  %v776_v28 = vld [vmem:[%s1271_s2] ss:$0 sm:$0xff] }
  0x39   :  { %918 = vmatpush3.bf16.msra.mxu1 %v987_v7  ;;  %v52_v15 = vcombine.high %v44_v11, %v44_v11  ;;  %v51_v16 = vrot.slane %v37_v12, %v1152_v41  ;;  %897 = vmatprep.subr.bf16.mxu0 %v988_v8  ;;  %v994_v21 = vld [vmem:[%s1270_s1 + $0x138] sm:$0xff]   ;;  %v66_v24 = vpack.c.bf16 %v44_v11, %v44_v11 }
  0x3a   :  { %919 = vmatprep.subr.bf16.mxu1 %v989_v9  ;;  %v995_v22 = vld [vmem:[%s1270_s1 + $0x1b8] sm:$0xff]   ;;  %s1026_s1 = smov [#allocation2]  }
  0x3b   :  { %v67_v19 = vpack.c.bf16 %v52_v15, %v52_v15  ;;  %v53_v20 = vcombine.high %v51_v16, %v51_v16  ;;  %v68_v25 = vpack.c.bf16 %v51_v16, %v51_v16  ;;  %s768_s2 = sshll.u32 %s1026_s1, 4  ;;  %s769_s2 = int_to_ptr.vmem [resolvable:$true] %s768_s2 }
  0x3c   :  { %898 = vmatpush3.bf16.msra.mxu0 %v990_v13  ;;  %s1001_s10 = scalar_lea.vmem %s769_s2, 32  ;;  %p1006_p1 = scmp.lt.s32.totalorder %s769_s2, %s769_s2 }
  0x3d   :  { %920 = vmatpush3.bf16.msra.mxu1 %v991_v14  ;;  %v69_v23 = vpack.c.bf16 %v53_v20, %v53_v20  ;;  %899 = vmatprep.subr.bf16.mxu0 %v992_v17  ;;  %p1002_p0 = scmp.ne.s32.totalorder %s769_s2, %s1001_s10  ;;  %p1007_p2 = scmp.lt.s32.totalorder %s1001_s10, %s1001_s10 }
  0x3e   :  { %921 = vmatprep.subr.bf16.mxu1 %v993_v18  ;;  %701 = vmatprep.mubr.bf16.mxu0 %v67_v19 }
  0x3f   :  { %741 = vmatprep.mubr.bf16.mxu1 %v69_v23  ;;  %p1008_p3 = por %p1007_p2, %p1006_p1 }
  0x40   :  { %900 = vmatpush3.bf16.msra.mxu0 %v994_v21 }
  0x41   :  { %922 = vmatpush3.bf16.msra.mxu1 %v995_v22  ;;  %p1009_p4 = pnand %p1008_p3, %p1002_p0 }
  0x43   :  { %702 = vmatmul.mubr.bf16.vlgmr.msra.gmra.mrb[4].mxu0 %v66_v24 }
  0x44   :  { %742 = vmatmul.mubr.bf16.vlgmr.msra.gmra.mrb[4].mxu1 %v68_v25 }
  0xf6   :  { %v857_v26 = vpop.f32.mrb[0].mxu0 }
  0xf7   :  { %v879_v27 = vpop.f32.mrb[0].mxu1  ;;  %v858_v29 = vpop.f32.mrb[1].mxu0 }
  0xf8   :  { %v880_v30 = vpop.f32.mrb[1].mxu1  ;;  %v859_v31 = vadd.f32 %v858_v29, %v857_v26  ;;  %v860_v33 = vpop.f32.mrb[2].mxu0 }
  0xf9   :  { %v881_v32 = vadd.f32 %v880_v30, %v879_v27  ;;  %v882_v34 = vpop.f32.mrb[2].mxu1  ;;  %v861_v35 = vpop.f32.mrb[3].mxu0 }
  0xfa   :  { %v883_v36 = vpop.f32.mrb[3].mxu1  ;;  %v624_v37 = vadd.f32 %v859_v31, %v776_v28 }
  0xfc   :  { %v664_v38 = vadd.f32 %v881_v32, %v624_v37 }
 0x116   :  { %v901_v39 = vpop.f32.mrb[4].mxu0 }
 0x117   :  { %v923_v40 = vpop.f32.mrb[4].mxu1  ;;  %v902_v41 = vpop.f32.mrb[5].mxu0 }
 0x118   :  { %v924_v42 = vpop.f32.mrb[5].mxu1  ;;  %v903_v43 = vadd.f32 %v902_v41, %v901_v39  ;;  %v904_v45 = vpop.f32.mrb[6].mxu0 }
 0x119   :  { %v925_v44 = vadd.f32 %v924_v42, %v923_v40  ;;  %v926_v46 = vpop.f32.mrb[6].mxu1  ;;  %v905_v47 = vpop.f32.mrb[7].mxu0 }
 0x11a   :  { %v927_v48 = vpop.f32.mrb[7].mxu1  ;;  %v704_v49 = vadd.f32 %v903_v43, %v664_v38 }
 0x11c   :  { %v744_v50 = vadd.f32 %v925_v44, %v704_v49 }
 0x11e   :  { %v750_v51 = vsel %vm749_vm0, %v744_v50, -inf }
 0x11f   :  { %751 = vmax.xlane.f32.xlu0 %v750_v51 }
 0x1ac   :  { %v752_v52 = vpop.xlane.xlu0 %751 }
 0x1ad   :  { %v753_v53 = vsub.f32 %v744_v50, %v752_v52 }
 0x1af   :  { %v754_v54 = vmul.f32 1.442695, %v753_v53 }
 0x1b1   :  { %997 = vpow2.f32 %v754_v54 }
 0x1bb   :  { %v998_v55 = vpop.eup %997 }
 0x1bc   :  { %v756_v56 = vsel %vm749_vm0, %v998_v55, 0.0 }
 0x1bd   :  { %757 = vadd.xlane.f32.xlu0 %v756_v56 }
 0x24a   :  { %v758_v57 = vpop.xlane.xlu0 %757 }
 0x24b   :  { %999 = vrcp.f32 %v758_v57 }
 0x255   :  { %v1000_v58 = vpop.eup %999 }
 0x256   :  { %v760_v59 = vmul.f32 %v1000_v58, %v998_v55 }
 0x258   :  { %761 = vst.msk [vmem:[#allocation2] sm:$0x3] %vm749_vm0, %v760_v59 }
 0x259   :  { %1012 = shalt.err (!%p1009_p4)
}
 0x25a   :  { %s1013_s13 = scalar_lea.hbm %s1272_s3, 32 }
 0x25b   :  { %p1014_p5 = scmp.ne.s32.totalorder %s1272_s3, %s1013_s13  ;;  %p1017_p6 = scmp.lt.u32.totalorder %s1013_s13, %s1272_s3 }
 0x25d   :  { %p1019_p7 = pnand %p1017_p6, %p1014_p5 }
 0x25f   :  { %1022 = shalt.err (!%p1019_p7)
}
 0x260   :  { %771 = dma.vmem_to_hbm [thread:$0]  %s769_s2, 32, %s1272_s3, [#allocation3]  }
 0x261   :  { %1023 = dma.done.wait [#allocation3], 32  }
 0x262   :  { %1024 = vsyncadd [#allocation3], 4294967264 }
 0x263   :  { %775 = vsyncpa [#allocation3], 1 }

</bundles_post_ra>
